<compile_context>
chip_gen: v6e
topology: v6e:2x2x1
jax: 0.10.0
libtpu: 0.0.40
codegen_flags: <defaults>
</compile_context>

<pallas_src>
import numpy as np
import jax
import jax.numpy as jnp
from jax.experimental import pallas as pl
from jax.experimental.pallas import tpu as pltpu


# --------------------------- fused Pallas kernel -----------------------------

def _conv_ae_fused_kernel(x_ref, we_ref, be_ref, c1_ref, c1t_ref, wd_ref, bd_ref,
                          z1_ref, y_ref, out_ref):
    """Whole ConvAE forward on VMEM-resident arrays (grid=()).

    x   : (Bp, H*W)   bf16  flattened, batch-padded input image
    we  : (H*W, D)    bf16  encoder stride-2 conv as a dense linear operator
    be  : (1, D)      f32   encoder bias (per channel, broadcast over ho*wo)
    c1  : (Bp, R)     f32   self-expressive coefficients (padded rows are 0)
    c1t : (R, Bp)     bf16  C1^T, prepared in the wrapper
    wd  : (D, H*W)    bf16  decoder conv-transpose (+crop) as dense operator
    bd  : (1, H*W)    f32   decoder bias (scalar broadcast)
    outputs: z1 (Bp, D), y (Bp, D), out (Bp, H*W) — f32, lane-dense (256 lanes)
    """
    # encoder: relu(X @ We + be)        bf16 MXU feeds, f32 accumulate/bias/ReLU
    z1 = jnp.maximum(
        jnp.dot(x_ref[...], we_ref[...], preferred_element_type=jnp.float32)
        + be_ref[...], 0.0)
    z1_ref[...] = z1

    # self-expressive, factorized (no (B,B) Gram):
    #   Y = C1 (C1^T Z1) - diag(C1 C1^T) ⊙ Z1
    c1 = c1_ref[...]                                            # (Bp, R) f32
    z1_bf = z1.astype(jnp.bfloat16)
    t = jnp.dot(c1t_ref[...], z1_bf,
                preferred_element_type=jnp.float32)             # (R, D)  f32
    diag = jnp.sum(c1 * c1, axis=1, keepdims=True)              # (Bp, 1) f32
    y = (jnp.dot(c1.astype(jnp.bfloat16), t.astype(jnp.bfloat16),
                 preferred_element_type=jnp.float32)
         - diag * z1)
    y_ref[...] = y

    # decoder: relu(Y @ Wd + bd)
    out_ref[...] = jnp.maximum(
        jnp.dot(y.astype(jnp.bfloat16), wd_ref[...],
                preferred_element_type=jnp.float32) + bd_ref[...], 0.0)


# ------------------- weight preprocessing (data independent) -----------------

def _enc_conv_as_matrix(w, H, W, ho, wo):
    """w: (nh, k, k).  ZeroPad2d((0,2,0,2)) + Conv2d(1,nh,k,stride=2) expressed
    as a dense (H*W, nh*ho*wo) matrix acting on the flattened H*W input."""
    nh, k, _ = w.shape
    dh = jnp.arange(H)[:, None] - 2 * jnp.arange(ho)[None, :]     # (H, ho)
    dw = jnp.arange(W)[:, None] - 2 * jnp.arange(wo)[None, :]     # (W, wo)
    mh = (dh >= 0) & (dh < k)
    mw = (dw >= 0) & (dw < k)
    tap = w[:, jnp.clip(dh, 0, k - 1)[:, :, None, None],
              jnp.clip(dw, 0, k - 1)[None, None, :, :]]           # (nh,H,ho,W,wo)
    tap = jnp.where((mh[:, :, None, None] & mw[None, None])[None], tap, 0.0)
    tap = jnp.transpose(tap, (1, 3, 0, 2, 4))                     # (H,W,nh,ho,wo)
    return tap.reshape(H * W, nh * ho * wo)


def _dec_convT_as_matrix(w, ho, wo, H_out, W_out):
    """w: (nh, k, k).  ConvTranspose2d(nh,1,k,stride=2) + ZeroPad2d((0,-1,0,-1))
    crop, expressed as a dense (nh*ho*wo, H_out*W_out) matrix."""
    nh, k, _ = w.shape
    dh = jnp.arange(H_out)[None, :] - 2 * jnp.arange(ho)[:, None]  # (ho, H_out)
    dw = jnp.arange(W_out)[None, :] - 2 * jnp.arange(wo)[:, None]  # (wo, W_out)
    mh = (dh >= 0) & (dh < k)
    mw = (dw >= 0) & (dw < k)
    tap = w[:, jnp.clip(dh, 0, k - 1)[:, :, None, None],
              jnp.clip(dw, 0, k - 1)[None, None, :, :]]        # (nh,ho,Hout,wo,Wout)
    tap = jnp.where((mh[:, :, None, None] & mw[None, None])[None], tap, 0.0)
    tap = jnp.transpose(tap, (0, 1, 3, 2, 4))                  # (nh,ho,wo,Hout,Wout)
    return tap.reshape(nh * ho * wo, H_out * W_out)


def build_operators(params, H, W):
    """Run once per weight update (hoisted out of the jitted forward):
    dense conv operators (bf16), broadcast biases (f32), batch-padded C1."""
    w_enc, b_enc, c1, w_dec, b_dec = (params["w_enc"], params["b_enc"],
                                      params["C1"], params["w_dec"],
                                      params["b_dec"])
    nh, _, k, _ = w_enc.shape
    ho = (H + 2 - k) // 2 + 1
    wo = (W + 2 - k) // 2 + 1
    H_out = 2 * ho + k - 3            # conv-transpose size minus 1 (crop)
    W_out = 2 * wo + k - 3
    D = nh * ho * wo

    we_mat = _enc_conv_as_matrix(w_enc[:, 0], H, W, ho, wo).astype(jnp.bfloat16)
    be_vec = jnp.broadcast_to(b_enc[:, None], (nh, ho * wo)).reshape(1, D)
    be_vec = be_vec.astype(jnp.float32)
    wd_mat = _dec_convT_as_matrix(
        w_dec[:, 0], ho, wo, H_out, W_out).astype(jnp.bfloat16)
    bd_vec = jnp.broadcast_to(
        b_dec.reshape(1, 1), (1, H_out * W_out)).astype(jnp.float32)

    B = c1.shape[0]
    Bp = ((B + 7) // 8) * 8           # pad batch to 8-sublane granularity
    c1_pad = jnp.pad(c1, ((0, Bp - B), (0, 0))) if Bp != B else c1
    c1_pad = c1_pad.astype(jnp.float32)

    return {"we": we_mat, "be": be_vec, "wd": wd_mat, "bd": bd_vec,
            "c1": c1_pad, "c1t": c1_pad.T.astype(jnp.bfloat16)}


# ------------------------------- forward -------------------------------------

def conv_ae_forward(x, params, ops):
    """Returns (Z1, Y, C1, output) — same semantics as ConvAE.forward."""
    B, _, H, W = x.shape
    nh, _, k, _ = params["w_enc"].shape
    ho = (H + 2 - k) // 2 + 1
    wo = (W + 2 - k) // 2 + 1
    H_out = 2 * ho + k - 3
    W_out = 2 * wo + k - 3
    D = nh * ho * wo
    HW_in = H * W
    HW_out = H_out * W_out
    Bp, R = ops["c1"].shape

    x_flat = x.reshape(B, HW_in)
    if Bp != B:
        x_flat = jnp.pad(x_flat, ((0, Bp - B), (0, 0)))
    x_bf = x_flat.astype(jnp.bfloat16)

    cost = pl.CostEstimate(
        flops=2 * Bp * D * (HW_in + 2 * R + HW_out),
        transcendentals=0,
        bytes_accessed=(Bp * HW_in * 2 + HW_in * D * 2 + D * 4
                        + Bp * R * 4 + R * Bp * 2 + D * HW_out * 2 + HW_out * 4
                        + 2 * Bp * D * 4 + Bp * HW_out * 4))

    vmem = pl.BlockSpec(memory_space=pltpu.MemorySpace.VMEM)

    z1_flat, y_flat, out_flat = pl.pallas_call(
        _conv_ae_fused_kernel,
        out_shape=(jax.ShapeDtypeStruct((Bp, D), jnp.float32),
                   jax.ShapeDtypeStruct((Bp, D), jnp.float32),
                   jax.ShapeDtypeStruct((Bp, HW_out), jnp.float32)),
        in_specs=[vmem] * 7,
        out_specs=(vmem, vmem, vmem),
        cost_estimate=cost,
    )(x_bf, ops["we"], ops["be"], ops["c1"], ops["c1t"], ops["wd"], ops["bd"])

    # flatten order inside the kernel is (c, i, j) per batch -> plain reshapes
    z1 = z1_flat[:B].reshape(B, nh, ho, wo)
    y = y_flat[:B].reshape(B, nh, ho, wo)
    out = out_flat[:B].reshape(B, 1, H_out, W_out)
    return z1, y, params["C1"], out


# --------------------------- numpy reference ---------------------------------

def ref_forward_np(x, w_enc, b_enc, c1, w_dec, b_dec):
    x = np.asarray(x, np.float32)
    B, _, H, W = x.shape
    nh, _, k, _ = w_enc.shape
    xp = np.pad(x, ((0, 0), (0, 0), (0, 2), (0, 2)))
    ho = (H + 2 - k) // 2 + 1
    wo = (W + 2 - k) // 2 + 1
    z1 = np.zeros((B, nh, ho, wo), np.float32)
    for c in range(nh):
        for i in range(ho):
            for j in range(wo):
                z1[:, c, i, j] = (np.sum(xp[:, 0, 2 * i:2 * i + k, 2 * j:2 * j + k]
                                         * w_enc[c, 0], axis=(1, 2)) + b_enc[c])
    z1 = np.maximum(z1, 0)
    m = c1 @ c1.T
    a = m - np.diag(np.diag(m))
    y = (a @ z1.reshape(B, -1)).reshape(z1.shape)
    hf = (ho - 1) * 2 + k
    wf = (wo - 1) * 2 + k
    of = np.full((B, 1, hf, wf), b_dec[0], np.float32)
    for c in range(nh):
        for i in range(ho):
            for j in range(wo):
                of[:, 0, 2 * i:2 * i + k, 2 * j:2 * j + k] += (
                    y[:, c, i, j][:, None, None] * w_dec[c, 0])
    out = np.maximum(of[:, :, :hf - 1, :wf - 1], 0)
    return z1, y, out


# ------------------------------- main ----------------------------------------

if __name__ == "__main__":
    # small, ConvAE-consistent config:
    # kernelSize=[3], numHidden=[4], numSubj=2, numPerSubj=2 -> batchSize=4, rankE=4
    k, nh, num_subj, num_per_subj, rank_e = 3, 4, 2, 2, 4
    B, H, W = num_subj * num_per_subj, 16, 16

    key = jax.random.PRNGKey(0)
    kx, k1, k2, k3, k4, k5 = jax.random.split(key, 6)
    x = jax.random.normal(kx, (B, 1, H, W), jnp.float32)

    # NOTE: module __init__ sets C1 = zeros; deterministic random values are
    # used here so the self-expressive path is exercised non-trivially.
    params = {
        "w_enc": 0.1 * jax.random.normal(k1, (nh, 1, k, k), jnp.float32),
        "b_enc": 0.1 * jax.random.normal(k2, (nh,), jnp.float32),
        "C1":    0.1 * jax.random.normal(k3, (B, rank_e), jnp.float32),
        "w_dec": 0.1 * jax.random.normal(k4, (nh, 1, k, k), jnp.float32),
        "b_dec": 0.1 * jax.random.normal(k5, (1,), jnp.float32),
    }

    # weight-only preprocessing: once per weight update, outside the forward jit
    ops = jax.block_until_ready(build_operators(params, H, W))

    fwd = jax.jit(conv_ae_forward)
    z1, y, c1_out, out = jax.block_until_ready(fwd(x, params, ops))

    # verify against a pure-numpy reference of the PyTorch semantics
    z1_ref, y_ref, out_ref = ref_forward_np(
        np.asarray(x), np.asarray(params["w_enc"]), np.asarray(params["b_enc"]),
        np.asarray(params["C1"]), np.asarray(params["w_dec"]),
        np.asarray(params["b_dec"]))

    assert z1.shape == (B, nh, 8, 8) and y.shape == z1.shape
    assert out.shape == (B, 1, H, W) and c1_out.shape == (B, rank_e)
    # bf16 MXU feeds -> tolerances loosened vs. the all-f32 version
    np.testing.assert_allclose(np.asarray(z1), z1_ref, rtol=2e-2, atol=1e-2)
    np.testing.assert_allclose(np.asarray(y), y_ref, rtol=2e-2, atol=1e-2)
    np.testing.assert_allclose(np.asarray(out), out_ref, rtol=2e-2, atol=1e-2)
    np.testing.assert_allclose(np.asarray(c1_out), np.asarray(params["C1"]))

    print("KERNEL_OK")
</pallas_src>

<mosaic_0001>
module attributes {stable_mosaic.version = 11 : i64} {
  func.func @_conv_ae_fused_kernel(%arg0: memref<8x256xbf16, #tpu.memory_space<vmem>>, %arg1: memref<256x256xbf16, #tpu.memory_space<vmem>>, %arg2: memref<1x256xf32, #tpu.memory_space<vmem>>, %arg3: memref<8x4xf32, #tpu.memory_space<vmem>>, %arg4: memref<4x8xbf16, #tpu.memory_space<vmem>>, %arg5: memref<256x256xbf16, #tpu.memory_space<vmem>>, %arg6: memref<1x256xf32, #tpu.memory_space<vmem>>, %arg7: memref<8x256xf32, #tpu.memory_space<vmem>>, %arg8: memref<8x256xf32, #tpu.memory_space<vmem>>, %arg9: memref<8x256xf32, #tpu.memory_space<vmem>>) attributes {dimension_semantics = [], scalar_prefetch = 0 : i64, scratch_operands = 0 : i64, tpu.core_type = #tpu.core_type<tc>} {
    %c0 = arith.constant 0 : index
    %c0_0 = arith.constant 0 : index
    %0 = vector.load %arg0[%c0, %c0_0] : memref<8x256xbf16, #tpu.memory_space<vmem>>, vector<8x256xbf16>
    %c0_1 = arith.constant 0 : index
    %c0_2 = arith.constant 0 : index
    %1 = vector.load %arg1[%c0_1, %c0_2] : memref<256x256xbf16, #tpu.memory_space<vmem>>, vector<256x256xbf16>
    %cst = arith.constant dense<0.000000e+00> : vector<8x256xf32>
    %2 = tpu.matmul %0, %1, %cst {dimension_numbers = #tpu.dot_dimension_numbers<[1], [0], [0], [1], [0, 0, 1, 1], [], []>} : vector<8x256xbf16>, vector<256x256xbf16>, vector<8x256xf32> -> vector<8x256xf32>
    %c0_3 = arith.constant 0 : index
    %c0_4 = arith.constant 0 : index
    %3 = vector.load %arg2[%c0_3, %c0_4] : memref<1x256xf32, #tpu.memory_space<vmem>>, vector<1x256xf32>
    %4 = vector.broadcast %3 : vector<1x256xf32> to vector<8x256xf32>
    %5 = arith.addf %2, %4 : vector<8x256xf32>
    %cst_5 = arith.constant 0.000000e+00 : f32
    %6 = vector.broadcast %cst_5 : f32 to vector<8x256xf32>
    %7 = arith.maximumf %5, %6 : vector<8x256xf32>
    %c0_6 = arith.constant 0 : index
    %c0_7 = arith.constant 0 : index
    %8 = vector.load %arg7[%c0_6, %c0_7] : memref<8x256xf32, #tpu.memory_space<vmem>>, vector<8x256xf32>
    tpu.vector_store %arg7[%c0_6, %c0_7], %7 {strides = array<i32>} : memref<8x256xf32, #tpu.memory_space<vmem>>, vector<8x256xf32>,
    %c0_8 = arith.constant 0 : index
    %c0_9 = arith.constant 0 : index
    %9 = vector.load %arg3[%c0_8, %c0_9] : memref<8x4xf32, #tpu.memory_space<vmem>>, vector<8x4xf32>
    %10 = arith.truncf %7 : vector<8x256xf32> to vector<8x256xbf16>
    %c0_10 = arith.constant 0 : index
    %c0_11 = arith.constant 0 : index
    %11 = vector.load %arg4[%c0_10, %c0_11] : memref<4x8xbf16, #tpu.memory_space<vmem>>, vector<4x8xbf16>
    %cst_12 = arith.constant dense<0.000000e+00> : vector<4x256xf32>
    %12 = tpu.matmul %11, %10, %cst_12 {dimension_numbers = #tpu.dot_dimension_numbers<[1], [0], [0], [1], [0, 0, 1, 1], [], []>} : vector<4x8xbf16>, vector<8x256xbf16>, vector<4x256xf32> -> vector<4x256xf32>
    %13 = arith.mulf %9, %9 : vector<8x4xf32>
    %cst_13 = arith.constant dense<0.000000e+00> : vector<8xf32>
    %14 = vector.multi_reduction <add>, %13, %cst_13 [1] : vector<8x4xf32> to vector<8xf32>
    %15 = vector.shape_cast %14 : vector<8xf32> to vector<8x1xf32>
    %16 = arith.truncf %9 : vector<8x4xf32> to vector<8x4xbf16>
    %17 = arith.truncf %12 : vector<4x256xf32> to vector<4x256xbf16>
    %cst_14 = arith.constant dense<0.000000e+00> : vector<8x256xf32>
    %18 = tpu.matmul %16, %17, %cst_14 {dimension_numbers = #tpu.dot_dimension_numbers<[1], [0], [0], [1], [0, 0, 1, 1], [], []>} : vector<8x4xbf16>, vector<4x256xbf16>, vector<8x256xf32> -> vector<8x256xf32>
    %19 = vector.broadcast %15 : vector<8x1xf32> to vector<8x256xf32>
    %20 = arith.mulf %19, %7 : vector<8x256xf32>
    %21 = arith.subf %18, %20 : vector<8x256xf32>
    %c0_15 = arith.constant 0 : index
    %c0_16 = arith.constant 0 : index
    %22 = vector.load %arg8[%c0_15, %c0_16] : memref<8x256xf32, #tpu.memory_space<vmem>>, vector<8x256xf32>
    tpu.vector_store %arg8[%c0_15, %c0_16], %21 {strides = array<i32>} : memref<8x256xf32, #tpu.memory_space<vmem>>, vector<8x256xf32>,
    %23 = arith.truncf %21 : vector<8x256xf32> to vector<8x256xbf16>
    %c0_17 = arith.constant 0 : index
    %c0_18 = arith.constant 0 : index
    %24 = vector.load %arg5[%c0_17, %c0_18] : memref<256x256xbf16, #tpu.memory_space<vmem>>, vector<256x256xbf16>
    %cst_19 = arith.constant dense<0.000000e+00> : vector<8x256xf32>
    %25 = tpu.matmul %23, %24, %cst_19 {dimension_numbers = #tpu.dot_dimension_numbers<[1], [0], [0], [1], [0, 0, 1, 1], [], []>} : vector<8x256xbf16>, vector<256x256xbf16>, vector<8x256xf32> -> vector<8x256xf32>
    %c0_20 = arith.constant 0 : index
    %c0_21 = arith.constant 0 : index
    %26 = vector.load %arg6[%c0_20, %c0_21] : memref<1x256xf32, #tpu.memory_space<vmem>>, vector<1x256xf32>
    %27 = vector.broadcast %26 : vector<1x256xf32> to vector<8x256xf32>
    %28 = arith.addf %25, %27 : vector<8x256xf32>
    %cst_22 = arith.constant 0.000000e+00 : f32
    %29 = vector.broadcast %cst_22 : f32 to vector<8x256xf32>
    %30 = arith.maximumf %28, %29 : vector<8x256xf32>
    %c0_23 = arith.constant 0 : index
    %c0_24 = arith.constant 0 : index
    %31 = vector.load %arg9[%c0_23, %c0_24] : memref<8x256xf32, #tpu.memory_space<vmem>>, vector<8x256xf32>
    tpu.vector_store %arg9[%c0_23, %c0_24], %30 {strides = array<i32>} : memref<8x256xf32, #tpu.memory_space<vmem>>, vector<8x256xf32>,
    return
  }
}

</mosaic_0001>

<bundles_post_ra>
// kernel: conv_ae_forward.1
= control target key start
LH: loop header
LB: loop body
LE: loop exit
PB: predicated region body
PF: predicated region fallthrough
CT: control target
= control target key end

     0   :  { %15 = vsyncpa [#allocation3], 0  ;;  %s1044_s0 = inlined_call_operand.vmem [shape: bf16[8,256], index: 0, kind: input, shape index: {}]   ;;  %s1045_s1 = inlined_call_operand.hbm [shape: bf16[256,256], index: 1, kind: input, shape index: {}]   ;;  %s1046_s2 = inlined_call_operand.vmem [shape: f32[1,256], index: 2, kind: input, shape index: {}]   ;;  %s1047_s3 = inlined_call_operand.vmem [shape: f32[8,4], index: 3, kind: input, shape index: {}]   ;;  %s1048_s4 = inlined_call_operand.vmem [shape: bf16[4,8], index: 4, kind: input, shape index: {}]   ;;  %s1049_s5 = inlined_call_operand.hbm [shape: bf16[256,256], index: 5, kind: input, shape index: {}]   ;;  %s1050_s6 = inlined_call_operand.vmem [shape: f32[1,256], index: 6, kind: input, shape index: {}]   ;;  %s1051_s7 = inlined_call_operand.vmem [shape: f32[8,256], index: 7, kind: output, shape index: {0}]   ;;  %s1052_s8 = inlined_call_operand.vmem [shape: f32[8,256], index: 8, kind: output, shape index: {1}]   ;;  %s1053_s9 = inlined_call_operand.vmem [shape: f32[8,256], index: 9, kind: output, shape index: {2}]  }
   0x1   :  { %16 = vsyncpa [#allocation5], 0  ;;  %s918_s30 = smov [#allocation2]  }
   0x2   :  { %s24_s10 = sshll.u32 %s918_s30, 4  ;;  %s25_s10 = int_to_ptr.vmem [resolvable:$true] %s24_s10 }
   0x3   :  { %s882_s11 = scalar_lea.vmem %s25_s10, 4096  ;;  %p887_p1 = scmp.lt.s32.totalorder %s25_s10, %s25_s10 }
   0x4   :  { %p883_p0 = scmp.ne.s32.totalorder %s25_s10, %s882_s11  ;;  %p888_p2 = scmp.lt.s32.totalorder %s882_s11, %s882_s11 }
   0x6   :  { %p889_p3 = por %p888_p2, %p887_p1 }
   0x8   :  { %p890_p4 = pnand %p889_p3, %p883_p0 }
   0xa   :  { %893 = shalt.err (!%p890_p4)
}
   0xb   :  { %s919_s12 = smov 128   ;;  %s920_s13 = smov 8  }
   0xc   :  { %30 = dma.hbm_to_vmem [thread:$0]  %s1045_s1, 4096, %s25_s10, [#allocation3], %s919_s12, %s919_s12, %s920_s13  }
   0xd   :  { %s921_s16 = smov [#allocation4]  }
   0xe   :  { %s42_s17 = sshll.u32 %s921_s16, 4  ;;  %s43_s17 = int_to_ptr.vmem [resolvable:$true] %s42_s17 }
   0xf   :  { %s902_s18 = scalar_lea.vmem %s43_s17, 4096  ;;  %p907_p6 = scmp.lt.s32.totalorder %s43_s17, %s43_s17 }
  0x10   :  { %p903_p5 = scmp.ne.s32.totalorder %s43_s17, %s902_s18  ;;  %p908_p7 = scmp.lt.s32.totalorder %s902_s18, %s902_s18 }
  0x12   :  { %p909_p8 = por %p908_p7, %p907_p6 }
  0x14   :  { %p910_p9 = pnand %p909_p8, %p903_p5 }
  0x16   :  { %913 = shalt.err (!%p910_p9)
}
  0x17   :  { %48 = dma.hbm_to_vmem [thread:$0]  %s1049_s5, 4096, %s43_s17, [#allocation5], %s919_s12, %s919_s12, %s920_s13  }
  0x18   :  { %914 = dma.done.wait [#allocation3], 4096  }
  0x19   :  { %915 = vsyncadd [#allocation3], 4294963200 }
  0x1a   :  { %916 = dma.done.wait [#allocation5], 4096  }
  0x1b   :  { %917 = vsyncadd [#allocation5], 4294963200  ;;  %v776_v0 = vld [vmem:[#allocation2 + $0x74] ss:$8 sps:$4 sm:$0xff]   ;;  %v778_v1 = vld [vmem:[#allocation2 + $0x70] ss:$8 sps:$4 sm:$0xff]   ;;  %v93_v39 = vlaneseq }
  0x1c   :  { %270 = vmatprep.subr.bf16.mxu0 %v776_v0  ;;  %v779_v2 = vld [vmem:[#allocation2 + $0x64] ss:$8 sps:$4 sm:$0xff]   ;;  %v781_v3 = vld [vmem:[#allocation2 + $0x60] ss:$8 sps:$4 sm:$0xff]   ;;  %v782_v4 = vld [vmem:[#allocation2 + $0x54] ss:$8 sps:$4 sm:$0xff]  }
  0x1d   :  { %271 = vmatpush1.bf16.msra.mxu0 %v778_v1  ;;  %v784_v5 = vld [vmem:[#allocation2 + $0x50] ss:$8 sps:$4 sm:$0xff]   ;;  %v785_v6 = vld [vmem:[#allocation2 + $0x44] ss:$8 sps:$4 sm:$0xff]   ;;  %v787_v7 = vld [vmem:[#allocation2 + $0x40] ss:$8 sps:$4 sm:$0xff]  }
  0x1e   :  { %272 = vmatprep.subr.bf16.mxu0 %v779_v2  ;;  %v788_v8 = vld [vmem:[#allocation2 + $0x34] ss:$8 sps:$4 sm:$0xff]   ;;  %v790_v9 = vld [vmem:[#allocation2 + $0x30] ss:$8 sps:$4 sm:$0xff]   ;;  %v791_v10 = vld [vmem:[#allocation2 + $0x24] ss:$8 sps:$4 sm:$0xff]  }
  0x1f   :  { %v793_v11 = vld [vmem:[#allocation2 + $0x20] ss:$8 sps:$4 sm:$0xff]   ;;  %v794_v12 = vld [vmem:[#allocation2 + $0x14] ss:$8 sps:$4 sm:$0xff]   ;;  %v796_v13 = vld [vmem:[#allocation2 + $0x10] ss:$8 sps:$4 sm:$0xff]  }
  0x20   :  { %v58_v14 = vld [vmem:[%s1044_s0] sm:$0xff]  ;;  %vm372_vm0 = vcmask 31744   ;;  %v800_v21 = vld [vmem:[#allocation2 + $0xf4] ss:$8 sps:$4 sm:$0xff]   ;;  %v802_v22 = vld [vmem:[#allocation2 + $0xf0] ss:$8 sps:$4 sm:$0xff]  }
  0x21   :  { %273 = vmatpush1.bf16.msra.mxu0 %v781_v3  ;;  %v985_v15 = vld [vmem:[%s1047_s3] sm:$0xff]  ;;  %v702_v17 = vcombine.high %v58_v14, %v58_v14  ;;  %v806_v25 = vld [vmem:[#allocation2 + $0xd4] ss:$8 sps:$4 sm:$0xff]   ;;  %v808_v26 = vld [vmem:[#allocation2 + $0xd0] ss:$8 sps:$4 sm:$0xff]   ;;  %v701_v37 = vcombine.low %v58_v14, %v58_v14  ;;  %v922_v38 = vmov 0  }
  0x22   :  { %274 = vmatprep.subr.bf16.mxu0 %v782_v4  ;;  %v797_v16 = vld [vmem:[#allocation2 + $0x4] ss:$8 sps:$4 sm:$0xff]   ;;  %v371_v18 = vmul.f32 %v985_v15, %v985_v15  ;;  %v799_v20 = vld [vmem:[#allocation2] ss:$8 sps:$4 sm:$0xff]   ;;  %v812_v29 = vld [vmem:[#allocation2 + $0xb4] ss:$8 sps:$4 sm:$0xff]   ;;  %421 = vmatprep.mubr.bf16.mxu1 %v922_v38  ;;  %v376_v0 = vpack.c.bf16 %v985_v15, %v985_v15 }
  0x23   :  { %302 = vmatprep.mubr.bf16.mxu0 %v702_v17  ;;  %v803_v23 = vld [vmem:[#allocation2 + $0xe4] ss:$8 sps:$4 sm:$0xff]   ;;  %v805_v24 = vld [vmem:[#allocation2 + $0xe0] ss:$8 sps:$4 sm:$0xff]   ;;  %v814_v30 = vld [vmem:[#allocation2 + $0xb0] ss:$8 sps:$4 sm:$0xff]  }
  0x24   :  { %v373_v19 = vsel %vm372_vm0, %v371_v18, 0.0  ;;  %v809_v27 = vld [vmem:[#allocation2 + $0xc4] ss:$8 sps:$4 sm:$0xff]   ;;  %v811_v28 = vld [vmem:[#allocation2 + $0xc0] ss:$8 sps:$4 sm:$0xff]   ;;  %v990_v40 = vshrl.u32 %v93_v39, 7 }
  0x25   :  { %275 = vmatpush1.bf16.msra.mxu0 %v784_v5  ;;  %374 = vadd.xlane.f32.xlu0 %v373_v19  ;;  %v815_v31 = vld [vmem:[#allocation2 + $0xa4] ss:$8 sps:$4 sm:$0xff]   ;;  %v817_v32 = vld [vmem:[#allocation2 + $0xa0] ss:$8 sps:$4 sm:$0xff]   ;;  %v818_v33 = vld [vmem:[#allocation2 + $0x94] ss:$8 sps:$4 sm:$0xff]  }
  0x26   :  { %276 = vmatprep.subr.bf16.mxu0 %v785_v6  ;;  %v820_v34 = vld [vmem:[#allocation2 + $0x90] ss:$8 sps:$4 sm:$0xff]   ;;  %v821_v35 = vld [vmem:[#allocation2 + $0x84] ss:$8 sps:$4 sm:$0xff]   ;;  %v823_v36 = vld [vmem:[#allocation2 + $0x80] ss:$8 sps:$4 sm:$0xff]  }
  0x27   :  { %v95_v41 = vsub.s32 0, %v990_v40  ;;  %v91_v42 = vld [vmem:[%s1046_s2] sm:$0x3]  ;;  %v99_v43 = vsub.s32 1, %v990_v40  ;;  %vm323_vm1 = vcmask 1043456   ;;  %vm319_vm2 = vcmask 64512  }
  0x28   :  { %v318_v57 = vld [vmem:[%s1048_s4] sm:$0x3]  ;;  %vm382_vm3 = vcmask 1041408   ;;  %v828_v62 = vld [vmem:[#allocation4 + $0x74] ss:$8 sps:$4 sm:$0xff]  }
  0x29   :  { %277 = vmatpush1.bf16.msra.mxu0 %v787_v7  ;;  %v96_v44 = vrot.slane %v91_v42, %v95_v41  ;;  %v100_v45 = vrot.slane %v91_v42, %v99_v43  ;;  %v826_v3 = vld [vmem:[#allocation4 + $0x70] ss:$8 sps:$4 sm:$0xff]   ;;  %v831_v4 = vld [vmem:[#allocation4 + $0x64] ss:$8 sps:$4 sm:$0xff]   ;;  %v829_v5 = vld [vmem:[#allocation4 + $0x60] ss:$8 sps:$4 sm:$0xff]  }
  0x2a   :  { %278 = vmatprep.subr.bf16.mxu0 %v788_v8  ;;  %v834_v6 = vld [vmem:[#allocation4 + $0x54] ss:$8 sps:$4 sm:$0xff]   ;;  %v832_v7 = vld [vmem:[#allocation4 + $0x50] ss:$8 sps:$4 sm:$0xff]   ;;  %v837_v8 = vld [vmem:[#allocation4 + $0x44] ss:$8 sps:$4 sm:$0xff]  }
  0x2b   :  { %v846_v14 = vld [vmem:[#allocation4 + $0x14] ss:$8 sps:$4 sm:$0xff]   ;;  %v844_v15 = vld [vmem:[#allocation4 + $0x10] ss:$8 sps:$4 sm:$0xff]   ;;  %v847_v17 = vld [vmem:[#allocation4] ss:$8 sps:$4 sm:$0xff]  }
  0x2c   :  { %v852_v18 = vld [vmem:[#allocation4 + $0xf4] ss:$8 sps:$4 sm:$0xff]   ;;  %v850_v19 = vld [vmem:[#allocation4 + $0xf0] ss:$8 sps:$4 sm:$0xff]  }
  0x2d   :  { %279 = vmatpush1.bf16.msra.mxu0 %v790_v9  ;;  %v835_v9 = vld [vmem:[#allocation4 + $0x40] ss:$8 sps:$4 sm:$0xff]  }
  0x2e   :  { %280 = vmatprep.subr.bf16.mxu0 %v791_v10  ;;  %v840_v10 = vld [vmem:[#allocation4 + $0x34] ss:$8 sps:$4 sm:$0xff]  }
  0x31   :  { %281 = vmatpush1.bf16.msra.mxu0 %v793_v11  ;;  %v838_v11 = vld [vmem:[#allocation4 + $0x30] ss:$8 sps:$4 sm:$0xff]  }
  0x32   :  { %282 = vmatprep.subr.bf16.mxu0 %v794_v12  ;;  %v843_v12 = vld [vmem:[#allocation4 + $0x24] ss:$8 sps:$4 sm:$0xff]  }
  0x35   :  { %283 = vmatpush1.bf16.msra.mxu0 %v796_v13  ;;  %v841_v13 = vld [vmem:[#allocation4 + $0x20] ss:$8 sps:$4 sm:$0xff]  }
  0x36   :  { %284 = vmatprep.subr.bf16.mxu0 %v797_v16  ;;  %v849_v16 = vld [vmem:[#allocation4 + $0x4] ss:$8 sps:$4 sm:$0xff]  }
  0x39   :  { %285 = vmatpush1.bf16.msra.mxu0 %v799_v20  ;;  %v855_v20 = vld [vmem:[#allocation4 + $0xe4] ss:$8 sps:$4 sm:$0xff]  }
  0x3a   :  { %286 = vmatprep.subr.bf16.mxu0 %v800_v21  ;;  %v853_v21 = vld [vmem:[#allocation4 + $0xe0] ss:$8 sps:$4 sm:$0xff]  }
  0x3d   :  { %287 = vmatpush2.bf16.msra.mxu0 %v802_v22  ;;  %v858_v22 = vld [vmem:[#allocation4 + $0xd4] ss:$8 sps:$4 sm:$0xff]  }
  0x3e   :  { %288 = vmatprep.subr.bf16.mxu0 %v803_v23  ;;  %v856_v23 = vld [vmem:[#allocation4 + $0xd0] ss:$8 sps:$4 sm:$0xff]  }
  0x41   :  { %289 = vmatpush2.bf16.msra.mxu0 %v805_v24  ;;  %v861_v24 = vld [vmem:[#allocation4 + $0xc4] ss:$8 sps:$4 sm:$0xff]  }
  0x42   :  { %290 = vmatprep.subr.bf16.mxu0 %v806_v25  ;;  %v859_v25 = vld [vmem:[#allocation4 + $0xc0] ss:$8 sps:$4 sm:$0xff]  }
  0x45   :  { %291 = vmatpush2.bf16.msra.mxu0 %v808_v26  ;;  %v864_v26 = vld [vmem:[#allocation4 + $0xb4] ss:$8 sps:$4 sm:$0xff]  }
  0x46   :  { %292 = vmatprep.subr.bf16.mxu0 %v809_v27  ;;  %v862_v27 = vld [vmem:[#allocation4 + $0xb0] ss:$8 sps:$4 sm:$0xff]  }
  0x49   :  { %293 = vmatpush2.bf16.msra.mxu0 %v811_v28  ;;  %v867_v28 = vld [vmem:[#allocation4 + $0xa4] ss:$8 sps:$4 sm:$0xff]  }
  0x4a   :  { %294 = vmatprep.subr.bf16.mxu0 %v812_v29  ;;  %v865_v29 = vld [vmem:[#allocation4 + $0xa0] ss:$8 sps:$4 sm:$0xff]  }
  0x4d   :  { %295 = vmatpush2.bf16.msra.mxu0 %v814_v30  ;;  %v870_v30 = vld [vmem:[#allocation4 + $0x94] ss:$8 sps:$4 sm:$0xff]  }
  0x4e   :  { %296 = vmatprep.subr.bf16.mxu0 %v815_v31  ;;  %v868_v31 = vld [vmem:[#allocation4 + $0x90] ss:$8 sps:$4 sm:$0xff]  }
  0x51   :  { %297 = vmatpush2.bf16.msra.mxu0 %v817_v32  ;;  %v873_v32 = vld [vmem:[#allocation4 + $0x84] ss:$8 sps:$4 sm:$0xff]  }
  0x52   :  { %298 = vmatprep.subr.bf16.mxu0 %v818_v33  ;;  %v871_v33 = vld [vmem:[#allocation4 + $0x80] ss:$8 sps:$4 sm:$0xff]  }
  0x55   :  { %299 = vmatpush2.bf16.msra.mxu0 %v820_v34 }
  0x56   :  { %300 = vmatprep.subr.bf16.mxu0 %v821_v35 }
  0x59   :  { %301 = vmatpush2.bf16.msra.mxu0 %v823_v36 }
  0x5c   :  { %303 = vmatmul.mubr.bf16.vlgmr.msra.gmra.mxu0 %v701_v37 }
  0x5d   :  { %362 = vmatprep.mubr.bf16.mxu0 %v922_v38 }
  0xae   :  { %v375_v34 = vpop.xlane.xlu0 %374 }
 0x11c   :  { %v304_v46 = vpop.f32.mrf.mxu0 }
 0x11d   :  { %v305_v47 = vadd.f32 %v304_v46, %v96_v44 }
 0x11e   :  { %v306_v48 = vpop.f32.mrf.mxu0 }
 0x11f   :  { %v1001_v49 = vmax.f32 %v305_v47, 0.0  ;;  %v307_v50 = vadd.f32 %v306_v48, %v100_v45  ;;  %v470_v48 = vld [vmem:[%s1050_s6] sm:$0x3] }
 0x120   :  { %v308_v51 = vpop.f32.mrf.mxu0 }
 0x121   :  { %313 = vst [vmem:[%s1051_s7] sm:$0xff] %v1001_v49  ;;  %v1007_v52 = vmax.f32 %v307_v50, 0.0  ;;  %v316_v53 = vpack.c.bf16 %v1001_v49, %v1001_v49  ;;  %v430_v35 = vmul.f32 %v375_v34, %v1001_v49  ;;  %v475_v49 = vrot.slane %v470_v48, %v95_v41 }
 0x122   :  { %v309_v54 = vpop.f32.mrf.mxu0  ;;  %v479_v50 = vrot.slane %v470_v48, %v99_v43 }
 0x123   :  { %314 = vst [vmem:[%s1051_s7 + $0x8] sm:$0xff] %v1007_v52  ;;  %v317_v55 = vpack.c.bf16 %v1007_v52, %v1007_v52  ;;  %v325_v56 = vsel %vm323_vm1, %v316_v53, 0  ;;  %v431_v37 = vmul.f32 %v375_v34, %v1007_v52 }
 0x125   :  { %735 = vmatprep.subr.msk.bf16.mxu0 %vm323_vm1, %v317_v55 }
 0x126   :  { %345 = vmatpush1.bf16.msra.mxu0 %v325_v56 }
 0x129   :  { %736 = vmatmul.mubr.msk.bf16.vlgmr.msra.gmra.mxu0 %vm319_vm2, %v318_v57 }
 0x1e9   :  { %v364_v58 = vpop.f32.mrf.mxu0 }
 0x1ea   :  { %v377_v59 = vpack.c.bf16 %v364_v58, %v364_v58 }
 0x1eb   :  { %v366_v60 = vpop.f32.mrf.mxu0 }
 0x1ec   :  { %v378_v61 = vpack.c.bf16 %v366_v60, %v366_v60  ;;  %v384_v1 = vsel %vm382_vm3, %v377_v59, 0 }
 0x1ed   :  { %v368_v63 = vpop.f32.mrf.mxu0 }
 0x1ee   :  { %737 = vmatprep.subr.msk.bf16.mxu1 %vm382_vm3, %v378_v61 }
 0x1ef   :  { %v369_v2 = vpop.f32.mrf.mxu0  ;;  %404 = vmatpush1.bf16.msra.mxu1 %v384_v1 }
 0x1f0   :  { %642 = vmatprep.subr.bf16.mxu1 %v828_v62 }
 0x1f2   :  { %738 = vmatmul.mubr.msk.bf16.vlgmr.msra.gmra.mxu1 %vm372_vm0, %v376_v0 }
 0x1f3   :  { %643 = vmatpush1.bf16.msra.mxu1 %v826_v3 }
 0x1f4   :  { %644 = vmatprep.subr.bf16.mxu1 %v831_v4 }
 0x1f7   :  { %645 = vmatpush1.bf16.msra.mxu1 %v829_v5 }
 0x1f8   :  { %646 = vmatprep.subr.bf16.mxu1 %v834_v6 }
 0x1fb   :  { %647 = vmatpush1.bf16.msra.mxu1 %v832_v7 }
 0x1fc   :  { %648 = vmatprep.subr.bf16.mxu1 %v837_v8 }
 0x1ff   :  { %649 = vmatpush1.bf16.msra.mxu1 %v835_v9 }
 0x200   :  { %650 = vmatprep.subr.bf16.mxu1 %v840_v10 }
 0x203   :  { %651 = vmatpush1.bf16.msra.mxu1 %v838_v11 }
 0x204   :  { %652 = vmatprep.subr.bf16.mxu1 %v843_v12 }
 0x207   :  { %653 = vmatpush1.bf16.msra.mxu1 %v841_v13 }
 0x208   :  { %654 = vmatprep.subr.bf16.mxu1 %v846_v14 }
 0x20b   :  { %655 = vmatpush1.bf16.msra.mxu1 %v844_v15 }
 0x20c   :  { %656 = vmatprep.subr.bf16.mxu1 %v849_v16 }
 0x20f   :  { %657 = vmatpush1.bf16.msra.mxu1 %v847_v17 }
 0x210   :  { %658 = vmatprep.subr.bf16.mxu1 %v852_v18 }
 0x213   :  { %659 = vmatpush2.bf16.msra.mxu1 %v850_v19 }
 0x214   :  { %660 = vmatprep.subr.bf16.mxu1 %v855_v20 }
 0x217   :  { %661 = vmatpush2.bf16.msra.mxu1 %v853_v21 }
 0x218   :  { %662 = vmatprep.subr.bf16.mxu1 %v858_v22 }
 0x21b   :  { %663 = vmatpush2.bf16.msra.mxu1 %v856_v23 }
 0x21c   :  { %664 = vmatprep.subr.bf16.mxu1 %v861_v24 }
 0x21f   :  { %665 = vmatpush2.bf16.msra.mxu1 %v859_v25 }
 0x220   :  { %666 = vmatprep.subr.bf16.mxu1 %v864_v26 }
 0x223   :  { %667 = vmatpush2.bf16.msra.mxu1 %v862_v27 }
 0x224   :  { %668 = vmatprep.subr.bf16.mxu1 %v867_v28 }
 0x227   :  { %669 = vmatpush2.bf16.msra.mxu1 %v865_v29 }
 0x228   :  { %670 = vmatprep.subr.bf16.mxu1 %v870_v30 }
 0x22b   :  { %671 = vmatpush2.bf16.msra.mxu1 %v868_v31 }
 0x22c   :  { %672 = vmatprep.subr.bf16.mxu1 %v873_v32 }
 0x22f   :  { %673 = vmatpush2.bf16.msra.mxu1 %v871_v33 }
 0x2b2   :  { %v423_v36 = vpop.f32.mrf.mxu1 }
 0x2b3   :  { %v432_v38 = vsub.f32 %v423_v36, %v430_v35 }
 0x2b4   :  { %v425_v39 = vpop.f32.mrf.mxu1 }
 0x2b5   :  { %434 = vst [vmem:[%s1052_s8] sm:$0xff] %v432_v38  ;;  %v433_v42 = vsub.f32 %v425_v39, %v431_v37  ;;  %v436_v46 = vpack.c.bf16 %v432_v38, %v432_v38 }
 0x2b6   :  { %v427_v44 = vpop.f32.mrf.mxu1 }
 0x2b7   :  { %435 = vst [vmem:[%s1052_s8 + $0x8] sm:$0xff] %v433_v42  ;;  %v437_v45 = vpack.c.bf16 %v433_v42, %v433_v42 }
 0x2b8   :  { %v428_v47 = vpop.f32.mrf.mxu1 }
 0x2b9   :  { %674 = vmatprep.mubr.bf16.mxu1 %v437_v45 }
 0x2ba   :  { %675 = vmatmul.mubr.bf16.vlgmr.msra.gmra.mxu1 %v436_v46 }
 0x37a   :  { %v676_v51 = vpop.f32.mrf.mxu1 }
 0x37b   :  { %v677_v52 = vadd.f32 %v676_v51, %v475_v49 }
 0x37c   :  { %v678_v53 = vpop.f32.mrf.mxu1 }
 0x37d   :  { %v683_v54 = vmax.f32 %v677_v52, 0.0  ;;  %v679_v55 = vadd.f32 %v678_v53, %v479_v50 }
 0x37e   :  { %v680_v56 = vpop.f32.mrf.mxu1 }
 0x37f   :  { %685 = vst [vmem:[%s1053_s9] sm:$0xff] %v683_v54  ;;  %v684_v57 = vmax.f32 %v679_v55, 0.0 }
 0x380   :  { %v681_v58 = vpop.f32.mrf.mxu1 }
 0x381   :  { %686 = vst [vmem:[%s1053_s9 + $0x8] sm:$0xff] %v684_v57 }
 0x382   :  { %699 = vsyncpa [#allocation3], 1 }
 0x383   :  { %700 = vsyncpa [#allocation5], 1 }

</bundles_post_ra>
